<compile_context>
chip_gen: v7x
topology: tpu7x:2x2x1
jax: 0.10.0
libtpu: 0.0.40
codegen_flags: <defaults>
</compile_context>

<pallas_src>
import functools

import jax
import jax.numpy as jnp
from jax.experimental import pallas as pl
from jax.experimental.pallas import tpu as pltpu


# ----------------------------------------------------------------------------
# Helpers
# ----------------------------------------------------------------------------
def _round_up(x, m):
    return ((x + m - 1) // m) * m


def _vmem_capacity_bytes():
    """Per-core VMEM capacity, with a conservative fallback."""
    try:
        cap = int(pltpu.get_tpu_info().vmem_capacity_bytes)
    except Exception:
        cap = 64 << 20  # v7x per-core VMEM — safe lower bound for all gens
    return max(32 << 20, min(cap, 256 << 20))


def _stream_budget_bytes(vmem_cap, weight_bytes):
    """Per-buffer streaming-tile budget (padded bytes), leaving room for the
    double-buffered window, intermediates and the (constant) weights."""
    limit = (vmem_cap * 3) // 4
    avail = max(limit - 2 * weight_bytes - (2 << 20), 4 << 20)
    return int(min(avail // 4, 16 << 20))


def _phase1_row_tile(N, M, H, budget_bytes):
    """Rows per phase-1 tile (multiple of 8), padded-byte accounting."""
    h_pad = _round_up(H, 128)
    per_row = M * h_pad * 4
    max_rows = max(8, (budget_bytes // per_row) // 8 * 8)
    return int(min(_round_up(N, 8), max_rows))


def _phase2_row_tile(R, M, budget_bytes):
    """Sublane rows (of 128 lanes) per phase-2 tile (multiple of 8)."""
    per_row = (M + 1) * 128 * 4  # M input rows + 1 output row
    max_rows = max(8, (budget_bytes // per_row) // 8 * 8)
    return int(min(R, max_rows))


# ----------------------------------------------------------------------------
# Fused single-kernel path: everything resident in VMEM (one HBM pass)
# ----------------------------------------------------------------------------
def fused_attn_kernel(emb_ref, wt_ref, b_ref, att_ref, out_ref, *, use_bf16):
    M, N, H = emb_ref.shape
    emb = emb_ref[...]                                        # (M, N, H) f32
    wt = wt_ref[...]                                          # (H, H) = W^T
    x = emb.reshape(M * N, H)                                 # N % 8 == 0 -> layout-preserving
    if use_bf16:
        x = x.astype(jnp.bfloat16)
        wt = wt.astype(jnp.bfloat16)
    h = jnp.tanh(jnp.dot(x, wt, preferred_element_type=jnp.float32) + b_ref[...])
    sp = jnp.sum(h.reshape(M, N, H), axis=1) * (1.0 / N)      # (M, H) per-view mean
    s = jnp.sum(sp * att_ref[...], axis=-1, keepdims=True)    # (M, 1) scores
    s = s - jnp.max(s, axis=0, keepdims=True)
    ex = jnp.exp(s)
    beta = ex / jnp.sum(ex, axis=0, keepdims=True)            # (M, 1) softmax
    z = beta[0:1, :] * emb[0]                                 # (1,1) * (N,H)
    for m in range(1, M):                                     # M is tiny, static
        z = z + beta[m:m + 1, :] * emb[m]
    out_ref[...] = z.astype(out_ref.dtype)


# ----------------------------------------------------------------------------
# Phase 1 (streaming path): per-view attention scores + softmax -> beta (M, 1)
# ----------------------------------------------------------------------------
def scores_kernel(emb_ref, wt_ref, b_ref, att_ref, beta_ref, acc_ref, *,
                  n_total, needs_mask, use_bf16):
    """emb_ref: (M, tn, H) tile of stacked views
       wt_ref : (H, H)  = W^T     b_ref / att_ref : (1, H)
       beta_ref: (M, 1) softmax weights (written on the last tile only)
       acc_ref : (M, H) VMEM accumulator of per-view tanh row-sums
    """
    i = pl.program_id(0)

    @pl.when(i == 0)
    def _init():
        acc_ref[...] = jnp.zeros_like(acc_ref)

    M, tn, H = emb_ref.shape
    x = emb_ref[...].reshape(M * tn, H)                       # tn % 8 == 0
    wt = wt_ref[...]
    if use_bf16:
        x = x.astype(jnp.bfloat16)
        wt = wt.astype(jnp.bfloat16)
    h = jnp.tanh(jnp.dot(x, wt, preferred_element_type=jnp.float32) + b_ref[...])
    h = h.reshape(M, tn, H)
    if needs_mask:
        # Partial last block: zero rows >= n_total BEFORE accumulation
        # (tanh(bias) != 0, and OOB rows are garbage).
        rows = jax.lax.broadcasted_iota(jnp.int32, (M, tn, H), 1)
        h = jnp.where(i * tn + rows < n_total, h, 0.0)
    acc_ref[...] += jnp.sum(h, axis=1)                        # per-view row sums

    @pl.when(i == pl.num_programs(0) - 1)
    def _finalize():
        sp = acc_ref[...] * (1.0 / n_total)                            # (M, H)
        s = jnp.sum(sp * att_ref[...], axis=-1, keepdims=True)         # (M, 1)
        s = s - jnp.max(s, axis=0, keepdims=True)
        ex = jnp.exp(s)
        beta_ref[...] = ex / jnp.sum(ex, axis=0, keepdims=True)


# ----------------------------------------------------------------------------
# Phase 2 (streaming path): z = sum_m beta[m] * embeds[m], (8,128)-dense tiles
# ----------------------------------------------------------------------------
def combine_kernel(beta_ref, emb_ref, out_ref):
    """beta_ref: (M,) f32 in SMEM
       emb_ref : (M, tr, 128) sublane+lane-dense chunk of flattened embeds
       out_ref : (tr, 128)    sublane+lane-dense chunk of flattened output
    """
    M = emb_ref.shape[0]
    acc = beta_ref[0] * emb_ref[0]                            # scalar * (tr, 128)
    for m in range(1, M):                                     # M is tiny, static
        acc = acc + beta_ref[m] * emb_ref[m]
    out_ref[...] = acc.astype(out_ref.dtype)


# ----------------------------------------------------------------------------
# Wrapper
# ----------------------------------------------------------------------------
@functools.partial(
    jax.jit,
    static_argnames=("force_two_phase", "use_bf16_matmul", "row_tile", "flat_row_tile"),
)
def attn_forward(embeds_stacked, fc_weight, fc_bias, att, *,
                 force_two_phase=False, use_bf16_matmul=False,
                 row_tile=None, flat_row_tile=None):
    """embeds_stacked: (M, N, H) f32; returns z_mc: (N, H) f32."""
    M, N, H = embeds_stacked.shape
    wt = fc_weight.T                   # kernel contracts x @ W^T (transpose free in XLA)
    b2 = fc_bias.reshape(1, H)
    att2 = att.reshape(1, H)

    vmem_cap = _vmem_capacity_bytes()
    vmem_limit = int((vmem_cap * 3) // 4)
    h_pad = _round_up(H, 128)
    weight_bytes = _round_up(H, 8) * h_pad * 4

    # ---- Fused single-kernel path (one HBM pass over embeds) ---------------
    emb_resident_bytes = M * _round_up(N, 8) * h_pad * 4      # padded VMEM footprint
    fused_ok = (
        not force_two_phase
        and N % 8 == 0                                        # layout-preserving reshape
        and emb_resident_bytes <= min(vmem_cap // 8, 12 << 20)
    )
    if fused_ok:
        return pl.pallas_call(
            functools.partial(fused_attn_kernel, use_bf16=use_bf16_matmul),
            out_shape=jax.ShapeDtypeStruct((N, H), jnp.float32),
            compiler_params=pltpu.CompilerParams(vmem_limit_bytes=vmem_limit),
        )(embeds_stacked, wt, b2, att2)

    budget = _stream_budget_bytes(vmem_cap, weight_bytes)

    # ---- Phase 1: scores + softmax -> beta ----------------------------------
    tn = row_tile if row_tile is not None else _phase1_row_tile(N, M, H, budget)
    assert tn % 8 == 0
    grid1 = (pl.cdiv(N, tn),)
    needs_mask = (N % tn) != 0
    beta = pl.pallas_call(
        functools.partial(scores_kernel, n_total=N, needs_mask=needs_mask,
                          use_bf16=use_bf16_matmul),
        out_shape=jax.ShapeDtypeStruct((M, 1), jnp.float32),
        grid=grid1,
        in_specs=[
            pl.BlockSpec((M, tn, H), lambda i: (0, i, 0)),
            pl.BlockSpec((H, H), lambda i: (0, 0)),
            pl.BlockSpec((1, H), lambda i: (0, 0)),
            pl.BlockSpec((1, H), lambda i: (0, 0)),
        ],
        out_specs=pl.BlockSpec((M, 1), lambda i: (0, 0)),
        scratch_shapes=[pltpu.VMEM((M, H), jnp.float32)],
        compiler_params=pltpu.CompilerParams(
            dimension_semantics=("arbitrary",),        # N axis is a reduction
            vmem_limit_bytes=vmem_limit,
        ),
    )(embeds_stacked, wt, b2, att2)

    # ---- Phase 2: (8,128)-dense weighted combine ----------------------------
    F = N * H
    F_pad = _round_up(F, 8 * 128)
    emb_flat = embeds_stacked.reshape(M, F)                   # row-major reshape: free
    if F_pad != F:
        # TODO(synk): for awkward F this pads (one extra copy); could instead
        # mask OOB sublane rows in-kernel.
        emb_flat = jnp.pad(emb_flat, ((0, 0), (0, F_pad - F)))
    R = F_pad // 128
    emb3 = emb_flat.reshape(M, R, 128)
    beta_vec = beta.reshape(M)

    tr = flat_row_tile if flat_row_tile is not None else _phase2_row_tile(R, M, budget)
    assert tr % 8 == 0
    grid2 = (pl.cdiv(R, tr),)
    z_flat = pl.pallas_call(
        combine_kernel,
        out_shape=jax.ShapeDtypeStruct((R, 128), jnp.float32),
        grid=grid2,
        in_specs=[
            pl.BlockSpec(memory_space=pltpu.MemorySpace.SMEM),   # beta (M,) scalars
            pl.BlockSpec((M, tr, 128), lambda i: (0, i, 0)),
        ],
        out_specs=pl.BlockSpec((tr, 128), lambda i: (i, 0)),
        compiler_params=pltpu.CompilerParams(
            dimension_semantics=("parallel",),        # megacore-friendly on v7x
            vmem_limit_bytes=vmem_limit,
        ),
    )(beta_vec, emb3)

    return z_flat.reshape(F_pad)[:F].reshape(N, H)


# ----------------------------------------------------------------------------
# Pure-JAX reference mirroring the PyTorch forward
# ----------------------------------------------------------------------------
def attn_reference(embeds_stacked, fc_weight, fc_bias, att):
    h = jnp.tanh(
        jnp.einsum("mnh,kh->mnk", embeds_stacked, fc_weight) + fc_bias[None, None, :]
    )
    sp = h.mean(axis=1)                               # (M, H)
    scores = (sp * att.reshape(1, -1)).sum(axis=-1)   # (M,)
    beta = jax.nn.softmax(scores)                     # (M,)
    return (beta[:, None, None] * embeds_stacked).sum(axis=0)


if __name__ == "__main__":
    key = jax.random.PRNGKey(0)

    def make_inputs(k, M, N, H):
        k_emb, k_w, k_b, k_att = jax.random.split(k, 4)
        xavier_std = 1.414 * (2.0 / (H + H)) ** 0.5
        fc_weight = xavier_std * jax.random.normal(k_w, (H, H), jnp.float32)  # nn.Linear.weight
        bound = 1.0 / (H ** 0.5)
        fc_bias = jax.random.uniform(k_b, (H,), jnp.float32, -bound, bound)   # nn.Linear.bias
        att = xavier_std * jax.random.normal(k_att, (1, H), jnp.float32)      # self.att
        embeds = jax.random.normal(k_emb, (M, N, H), jnp.float32)
        return embeds, fc_weight, fc_bias, att

    k1, k2 = jax.random.split(key)

    # --- Case 1: canonical small shapes -> fused single-kernel path ---------
    M, N, H = 3, 8, 32          # 3 views, 8 rows each, hidden_dim = 32
    embeds, fc_weight, fc_bias, att = make_inputs(k1, M, N, H)
    z_ref = attn_reference(embeds, fc_weight, fc_bias, att)

    z_fused = jax.block_until_ready(attn_forward(embeds, fc_weight, fc_bias, att))
    assert z_fused.shape == (N, H)
    assert jnp.allclose(z_fused, z_ref, rtol=1e-5, atol=1e-5), "fused path mismatch"

    # --- Case 2: same inputs through the two-phase streaming path -----------
    z_tiled = jax.block_until_ready(
        attn_forward(embeds, fc_weight, fc_bias, att,
                     force_two_phase=True, row_tile=8, flat_row_tile=8))
    assert jnp.allclose(z_tiled, z_ref, rtol=1e-5, atol=1e-5), "two-phase path mismatch"

    # --- Case 3: awkward sizes -> partial blocks, masking, padding ----------
    M3, N3, H3 = 4, 50, 96
    embeds3, w3, b3, att3 = make_inputs(k2, M3, N3, H3)
    z3_ref = attn_reference(embeds3, w3, b3, att3)
    z3 = jax.block_until_ready(
        attn_forward(embeds3, w3, b3, att3,
                     force_two_phase=True, row_tile=16, flat_row_tile=8))
    assert z3.shape == (N3, H3)
    assert jnp.allclose(z3, z3_ref, rtol=1e-4, atol=1e-4), "masked/tiled path mismatch"

    # --- Case 4: optional bf16 MXU path (v6e/v7x), loose tolerance ----------
    z_bf16 = jax.block_until_ready(
        attn_forward(embeds, fc_weight, fc_bias, att, use_bf16_matmul=True))
    assert jnp.allclose(z_bf16, z_ref, rtol=5e-2, atol=5e-2), "bf16 path mismatch"

    print("KERNEL_OK")
</pallas_src>

<mosaic_0001>
module attributes {stable_mosaic.version = 11 : i64} {
  func.func @fused_attn_kernel(%arg0: memref<3x8x32xf32, #tpu.memory_space<vmem>>, %arg1: memref<32x32xf32, #tpu.memory_space<vmem>>, %arg2: memref<1x32xf32, #tpu.memory_space<vmem>>, %arg3: memref<1x32xf32, #tpu.memory_space<vmem>>, %arg4: memref<8x32xf32, #tpu.memory_space<vmem>>) attributes {dimension_semantics = [], scalar_prefetch = 0 : i64, scratch_operands = 0 : i64, tpu.core_type = #tpu.core_type<tc>} {
    %c0 = arith.constant 0 : index
    %c0_0 = arith.constant 0 : index
    %c0_1 = arith.constant 0 : index
    %0 = vector.load %arg0[%c0, %c0_0, %c0_1] : memref<3x8x32xf32, #tpu.memory_space<vmem>>, vector<3x8x32xf32>
    %c0_2 = arith.constant 0 : index
    %c0_3 = arith.constant 0 : index
    %1 = vector.load %arg1[%c0_2, %c0_3] : memref<32x32xf32, #tpu.memory_space<vmem>>, vector<32x32xf32>
    %2 = vector.shape_cast %0 : vector<3x8x32xf32> to vector<24x32xf32>
    %cst = arith.constant dense<0.000000e+00> : vector<24x32xf32>
    %3 = tpu.matmul %2, %1, %cst {dimension_numbers = #tpu.dot_dimension_numbers<[1], [0], [0], [1], [0, 0, 1, 1], [], []>} : vector<24x32xf32>, vector<32x32xf32>, vector<24x32xf32> -> vector<24x32xf32>
    %c0_4 = arith.constant 0 : index
    %c0_5 = arith.constant 0 : index
    %4 = vector.load %arg2[%c0_4, %c0_5] : memref<1x32xf32, #tpu.memory_space<vmem>>, vector<1x32xf32>
    %5 = vector.broadcast %4 : vector<1x32xf32> to vector<24x32xf32>
    %6 = arith.addf %3, %5 : vector<24x32xf32>
    %7 = math.tanh %6 : vector<24x32xf32>
    %8 = vector.shape_cast %7 : vector<24x32xf32> to vector<3x8x32xf32>
    %cst_6 = arith.constant dense<0.000000e+00> : vector<3x32xf32>
    %9 = vector.multi_reduction <add>, %8, %cst_6 [1] : vector<3x8x32xf32> to vector<3x32xf32>
    %cst_7 = arith.constant 1.250000e-01 : f32
    %10 = vector.broadcast %cst_7 : f32 to vector<3x32xf32>
    %11 = arith.mulf %9, %10 : vector<3x32xf32>
    %c0_8 = arith.constant 0 : index
    %c0_9 = arith.constant 0 : index
    %12 = vector.load %arg3[%c0_8, %c0_9] : memref<1x32xf32, #tpu.memory_space<vmem>>, vector<1x32xf32>
    %13 = vector.broadcast %12 : vector<1x32xf32> to vector<3x32xf32>
    %14 = arith.mulf %11, %13 : vector<3x32xf32>
    %cst_10 = arith.constant dense<0.000000e+00> : vector<3xf32>
    %15 = vector.multi_reduction <add>, %14, %cst_10 [1] : vector<3x32xf32> to vector<3xf32>
    %16 = vector.shape_cast %15 : vector<3xf32> to vector<3x1xf32>
    %cst_11 = arith.constant dense<0xFF800000> : vector<1xf32>
    %17 = vector.multi_reduction <maximumf>, %16, %cst_11 [0] : vector<3x1xf32> to vector<1xf32>
    %18 = vector.shape_cast %17 : vector<1xf32> to vector<1x1xf32>
    %19 = vector.broadcast %18 : vector<1x1xf32> to vector<3x1xf32>
    %20 = arith.subf %16, %19 : vector<3x1xf32>
    %21 = math.exp %20 : vector<3x1xf32>
    %cst_12 = arith.constant dense<0.000000e+00> : vector<1xf32>
    %22 = vector.multi_reduction <add>, %21, %cst_12 [0] : vector<3x1xf32> to vector<1xf32>
    %23 = vector.shape_cast %22 : vector<1xf32> to vector<1x1xf32>
    %24 = vector.broadcast %23 : vector<1x1xf32> to vector<3x1xf32>
    %25 = arith.divf %21, %24 : vector<3x1xf32>
    %26 = vector.extract_strided_slice %25 {offsets = [0, 0], sizes = [1, 1], strides = [1, 1]} : vector<3x1xf32> to vector<1x1xf32>
    %27 = vector.extract_strided_slice %0 {offsets = [0, 0, 0], sizes = [1, 8, 32], strides = [1, 1, 1]} : vector<3x8x32xf32> to vector<1x8x32xf32>
    %28 = vector.shape_cast %27 : vector<1x8x32xf32> to vector<8x32xf32>
    %29 = vector.broadcast %26 : vector<1x1xf32> to vector<8x32xf32>
    %30 = arith.mulf %29, %28 : vector<8x32xf32>
    %31 = vector.extract_strided_slice %25 {offsets = [1, 0], sizes = [1, 1], strides = [1, 1]} : vector<3x1xf32> to vector<1x1xf32>
    %32 = vector.extract_strided_slice %0 {offsets = [1, 0, 0], sizes = [1, 8, 32], strides = [1, 1, 1]} : vector<3x8x32xf32> to vector<1x8x32xf32>
    %33 = vector.shape_cast %32 : vector<1x8x32xf32> to vector<8x32xf32>
    %34 = vector.broadcast %31 : vector<1x1xf32> to vector<8x32xf32>
    %35 = arith.mulf %34, %33 : vector<8x32xf32>
    %36 = arith.addf %30, %35 : vector<8x32xf32>
    %37 = vector.extract_strided_slice %25 {offsets = [2, 0], sizes = [1, 1], strides = [1, 1]} : vector<3x1xf32> to vector<1x1xf32>
    %38 = vector.extract_strided_slice %0 {offsets = [2, 0, 0], sizes = [1, 8, 32], strides = [1, 1, 1]} : vector<3x8x32xf32> to vector<1x8x32xf32>
    %39 = vector.shape_cast %38 : vector<1x8x32xf32> to vector<8x32xf32>
    %40 = vector.broadcast %37 : vector<1x1xf32> to vector<8x32xf32>
    %41 = arith.mulf %40, %39 : vector<8x32xf32>
    %42 = arith.addf %36, %41 : vector<8x32xf32>
    %c0_13 = arith.constant 0 : index
    %c0_14 = arith.constant 0 : index
    %43 = vector.load %arg4[%c0_13, %c0_14] : memref<8x32xf32, #tpu.memory_space<vmem>>, vector<8x32xf32>
    tpu.vector_store %arg4[%c0_13, %c0_14], %42 {strides = array<i32>} : memref<8x32xf32, #tpu.memory_space<vmem>>, vector<8x32xf32>,
    return
  }
}

</mosaic_0001>

<bundles_post_ra>
// kernel: attn_forward.1
= control target key start
LH: loop header
LB: loop body
LE: loop exit
PB: predicated region body
PF: predicated region fallthrough
CT: control target
= control target key end

     0   :  { %v302_v3 = vmov 0.0|0.0   ;;  %vm303_vm0 = vmmov 0   ;;  %v304_v6 = vmov 0.0   ;;  %s392_s0 = inlined_call_operand.vmem [shape: f32[3,8,32], index: 0, kind: input, shape index: {}]   ;;  %s393_s1 = inlined_call_operand.vmem [shape: f32[32,32], index: 1, kind: input, shape index: {}]   ;;  %s394_s2 = inlined_call_operand.vmem [shape: f32[1,32], index: 2, kind: input, shape index: {}]   ;;  %s395_s3 = inlined_call_operand.vmem [shape: f32[1,32], index: 3, kind: input, shape index: {}]   ;;  %s396_s4 = inlined_call_operand.hbm [shape: f32[8,32], index: 4, kind: output, shape index: {}]  }
   0x1   :  { %v21_v0 = vld [vmem:[%s393_s1] sm:$0xff]  ;;  %v22_v1 = vld [vmem:[%s393_s1 + $0x8] sm:$0xff]  ;;  %v23_v2 = vld [vmem:[%s393_s1 + $0x10] sm:$0xff]  ;;  %254 = vmatprep.subr.bf16.mxu0 %v302_v3  ;;  %260 = vmatprep.subr.bf16.mxu1 %v302_v3 }
   0x2   :  { %v255_v4 = vpack.c.bf16 %v22_v1, %v21_v0  ;;  %v24_v5 = vld [vmem:[%s393_s1 + $0x18] sm:$0xff]  ;;  %245 = vmatprep.mubr.msk.f32.mxu0 %vm303_vm0, %v304_v6  ;;  %248 = vmatprep.mubr.msk.f32.mxu1 %vm303_vm0, %v304_v6 }
   0x3   :  { %9 = vsyncpa [#allocation3], 0  ;;  %v258_v7 = vpack.c.bf16 %v24_v5, %v23_v2  ;;  %v348_v8 = vld [vmem:[%s392_s0] sm:$0xff]  ;;  %vm32_vm1 = vcmask 261120   ;;  %v353_v9 = vld [vmem:[%s392_s0 + $0x8] sm:$0xff]  ;;  %vm163_vm2 = vcmask 1041409  }
   0x4   :  { %256 = vmatpush3.bf16.msra.mxu0 %v255_v4  ;;  %262 = vmatpush3.bf16.msra.mxu1 %v255_v4  ;;  %v363_v10 = vld [vmem:[%s392_s0 + $0x10] sm:$0xff]  ;;  %v225_v11 = vld [vmem:[%s394_s2] ss:$0 sm:$0xff]  ;;  %vm166_vm3 = vcmask 1042434   ;;  %vm169_vm4 = vcmask 256000   ;;  %vm173_vm5 = vcmask 1042432  }
   0x5   :  { %257 = vmatprep.subr.bf16.mxu0 %v302_v3  ;;  %261 = vmatprep.subr.bf16.mxu1 %v302_v3  ;;  %v229_v44 = vld [vmem:[%s395_s3] ss:$0 sm:$0xff]  ;;  %s305_s3 = smov [#allocation2]  }
   0x6   :  { %s217_s30 = sshll.u32 %s305_s3, 4  ;;  %s218_s30 = int_to_ptr.vmem [resolvable:$true] %s217_s30 }
   0x7   :  { %s278_s5 = scalar_lea.vmem %s218_s30, 128  ;;  %p283_p1 = scmp.lt.s32.totalorder %s218_s30, %s218_s30 }
   0x8   :  { %259 = vmatpush3.bf16.msra.mxu0 %v258_v7  ;;  %263 = vmatpush3.bf16.msra.mxu1 %v258_v7  ;;  %p279_p0 = scmp.ne.s32.totalorder %s218_s30, %s278_s5  ;;  %p284_p2 = scmp.lt.s32.totalorder %s278_s5, %s278_s5 }
   0xa   :  { %p285_p3 = por %p284_p2, %p283_p1 }
   0xb   :  { %246 = vmatmul.mubr.msk.f32.vlgmr.msra.gmra.mrb[0].mxu0 %vm32_vm1, %v348_v8  ;;  %249 = vmatmul.mubr.msk.f32.vlgmr.msra.gmra.mrb[0].mxu1 %vm32_vm1, %v353_v9 }
   0xc   :  { %251 = vmatprep.mubr.msk.f32.mxu1 %vm303_vm0, %v304_v6  ;;  %p286_p4 = pnand %p285_p3, %p279_p0 }
   0xf   :  { %252 = vmatmul.mubr.msk.f32.gmra.mrb[2].mxu1 %vm32_vm1, %v363_v10 }
  0xde   :  { %v108_v12 = vpop.f32.mrb[0].mxu0  ;;  %v113_v13 = vpop.f32.mrb[0].mxu1 }
  0xdf   :  { %v109_v14 = vadd.f32 %v225_v11, %v108_v12  ;;  %v114_v15 = vadd.f32 %v225_v11, %v113_v13  ;;  %v250_v16 = vpop.f32.mrb[1].mxu1  ;;  %v247_v17 = vpop.f32.mrb[1].mxu0 }
  0xe1   :  { %268 = vtanh.f32 %v109_v14  ;;  %v193_v14 = vlaneseq }
  0xe2   :  { %270 = vtanh.f32 %v114_v15  ;;  %v118_v18 = vpop.f32.mrb[2].mxu1 }
  0xe3   :  { %v119_v19 = vadd.f32 %v225_v11, %v118_v18  ;;  %v253_v20 = vpop.f32.mrb[3].mxu1  ;;  %v194_v15 = vshrl.u32 %v193_v14, 7 }
  0xe5   :  { %272 = vtanh.f32 %v119_v19  ;;  %v195_v16 = vsub.s32 0, %v194_v15  ;;  %v200_v17 = vsub.s32 1, %v194_v15  ;;  %v206_v18 = vsub.s32 2, %v194_v15 }
  0xeb   :  { %v269_v21 = vpop.eup %268 }
  0xec   :  { %v271_v22 = vpop.eup %270  ;;  %v125_v23 = vsel %vm32_vm1, %v269_v21, 0.0 }
  0xed   :  { %v126_v24 = vrot.slane %v125_v23, 4  ;;  %v132_v25 = vsel %vm32_vm1, %v271_v22, 0.0 }
  0xee   :  { %v133_v26 = vrot.slane %v132_v25, 4 }
  0xef   :  { %v273_v27 = vpop.eup %272  ;;  %v127_v28 = vadd.f32 %v126_v24, %v125_v23 }
  0xf0   :  { %v134_v29 = vadd.f32 %v133_v26, %v132_v25  ;;  %v139_v30 = vsel %vm32_vm1, %v273_v27, 0.0 }
  0xf1   :  { %v140_v31 = vrot.slane %v139_v30, 4  ;;  %v128_v32 = vrot.slane %v127_v28, 2 }
  0xf2   :  { %v135_v33 = vrot.slane %v134_v29, 2 }
  0xf3   :  { %v129_v34 = vadd.f32 %v128_v32, %v127_v28  ;;  %v141_v35 = vadd.f32 %v140_v31, %v139_v30 }
  0xf4   :  { %v136_v36 = vadd.f32 %v135_v33, %v134_v29 }
  0xf5   :  { %v130_v37 = vrot.slane %v129_v34, 1  ;;  %v142_v38 = vrot.slane %v141_v35, 2 }
  0xf6   :  { %v137_v39 = vrot.slane %v136_v36, 1 }
  0xf7   :  { %v131_v40 = vadd.f32 %v130_v37, %v129_v34  ;;  %v143_v41 = vadd.f32 %v142_v38, %v141_v35 }
  0xf8   :  { %v138_v42 = vadd.f32 %v137_v39, %v136_v36 }
  0xf9   :  { %v144_v43 = vrot.slane %v143_v41, 1  ;;  %v146_v45 = vmul.f32 0.125, %v131_v40 }
  0xfa   :  { %v147_v46 = vmul.f32 0.125, %v138_v42 }
  0xfb   :  { %v145_v47 = vadd.f32 %v144_v43, %v143_v41  ;;  %v156_v50 = vmul.f32 %v229_v44, %v146_v45 }
  0xfc   :  { %v157_v48 = vmul.f32 %v229_v44, %v147_v46 }
  0xfd   :  { %v148_v49 = vmul.f32 0.125, %v145_v47 }
  0xfe   :  { %v162_v51 = vrot.slane %v157_v48, 7 }
  0xff   :  { %v158_v52 = vmul.f32 %v229_v44, %v148_v49 }
 0x100   :  { %v164_v53 = vsel %vm163_vm2, %v162_v51, %v156_v50 }
 0x101   :  { %v165_v54 = vrot.slane %v158_v52, 6 }
 0x103   :  { %v167_v55 = vsel %vm166_vm3, %v165_v54, %v164_v53 }
 0x104   :  { %v170_v56 = vsel %vm169_vm4, %v167_v55, 0.0 }
 0x105   :  { %171 = vadd.xlane.f32.xlu0 %v170_v56 }
 0x192   :  { %v172_v57 = vpop.xlane.xlu0 %171 }
 0x193   :  { %v174_v58 = vsel %vm173_vm5, %v172_v57, -inf }
 0x194   :  { %v175_v59 = vrot.slane %v174_v58, 4 }
 0x196   :  { %v176_v60 = vmax.f32 %v174_v58, %v175_v59 }
 0x198   :  { %v177_v61 = vrot.slane %v176_v60, 2 }
 0x19a   :  { %v178_v62 = vmax.f32 %v176_v60, %v177_v61 }
 0x19c   :  { %v179_v63 = vrot.slane %v178_v62, 1 }
 0x19e   :  { %v180_v0 = vmax.f32 %v178_v62, %v179_v63 }
 0x1a0   :  { %v181_v1 = vsub.f32 %v172_v57, %v180_v0 }
 0x1a2   :  { %v182_v2 = vmul.f32 1.442695, %v181_v1 }
 0x1a4   :  { %274 = vpow2.f32 %v182_v2 }
 0x1ae   :  { %v275_v3 = vpop.eup %274 }
 0x1af   :  { %v184_v4 = vsel %vm173_vm5, %v275_v3, 0.0 }
 0x1b0   :  { %v185_v5 = vrot.slane %v184_v4, 4 }
 0x1b2   :  { %v186_v6 = vadd.f32 %v185_v5, %v184_v4 }
 0x1b4   :  { %v187_v7 = vrot.slane %v186_v6, 2 }
 0x1b6   :  { %v188_v11 = vadd.f32 %v187_v7, %v186_v6 }
 0x1b8   :  { %v189_v12 = vrot.slane %v188_v11, 1 }
 0x1ba   :  { %v190_v13 = vadd.f32 %v189_v12, %v188_v11 }
 0x1bc   :  { %276 = vrcp.f32 %v190_v13 }
 0x1c6   :  { %v277_v19 = vpop.eup %276 }
 0x1c7   :  { %v192_v20 = vmul.f32 %v277_v19, %v275_v3 }
 0x1c9   :  { %v196_v21 = vrot.slane %v192_v20, %v195_v16  ;;  %v201_v22 = vrot.slane %v192_v20, %v200_v17  ;;  %v207_v23 = vrot.slane %v192_v20, %v206_v18 }
 0x1cb   :  { %v197_v24 = vmul.f32 %v196_v21, %v348_v8  ;;  %v202_v25 = vmul.f32 %v201_v22, %v353_v9  ;;  %v208_v27 = vmul.f32 %v207_v23, %v363_v10 }
 0x1cd   :  { %v203_v26 = vadd.f32 %v202_v25, %v197_v24 }
 0x1cf   :  { %v209_v28 = vadd.f32 %v208_v27, %v203_v26 }
 0x1d1   :  { %210 = vst.msk [vmem:[#allocation2] sm:$0xff] %vm32_vm1, %v209_v28 }
 0x1d2   :  { %289 = shalt.err (!%p286_p4)
}
 0x1d3   :  { %s290_s8 = scalar_lea.hbm %s396_s4, 128 }
 0x1d4   :  { %p291_p5 = scmp.ne.s32.totalorder %s396_s4, %s290_s8  ;;  %p294_p6 = scmp.lt.u32.totalorder %s290_s8, %s396_s4 }
 0x1d6   :  { %p296_p7 = pnand %p294_p6, %p291_p5 }
 0x1d8   :  { %299 = shalt.err (!%p296_p7)
}
 0x1d9   :  { %220 = dma.vmem_to_hbm [thread:$0]  %s218_s30, 128, %s396_s4, [#allocation3]  }
 0x1da   :  { %300 = dma.done.wait [#allocation3], 128  }
 0x1db   :  { %301 = vsyncadd [#allocation3], 4294967168 }
 0x1dc   :  { %224 = vsyncpa [#allocation3], 1 }

</bundles_post_ra>
